<compile_context>
chip_gen: v7x
topology: tpu7x:2x2x1
jax: 0.10.0
libtpu: 0.0.40
codegen_flags: <defaults>
</compile_context>

<pallas_src>
import functools

import jax
import jax.numpy as jnp
import numpy as np
from jax.experimental import pallas as pl
from jax.experimental.pallas import tpu as pltpu

LANES = 128
MAX_TILE_ROWS = 2048      # (2048, 128) f32 tile = 1 MiB
ACC_ROWS_TARGET = 256     # fixed-size VMEM accumulator (128 KiB f32)
NUM_CORES = 2             # leading "parallel" grid axis (v7x has 2 TCs/chip)


def _focal_elementwise(x, y, alpha, gamma, class_weight, logits):
    """Per-element focal loss term (all VPU/EUP math, f32)."""
    x = x.astype(jnp.float32)
    y = y.astype(jnp.float32)
    if logits:
        # numerically stable BCEWithLogits: max(x,0) - x*y + log1p(exp(-|x|))
        bce = jnp.maximum(x, 0.0) - x * y + jnp.log1p(jnp.exp(-jnp.abs(x)))
    else:
        # x is a probability; clamp logs at -100 like torch BCE
        log_p = jnp.maximum(jnp.log(x), -100.0)
        log_1mp = jnp.maximum(jnp.log(1.0 - x), -100.0)
        bce = -(y * log_p + (1.0 - y) * log_1mp)
    pt = jnp.exp(-bce)
    one_minus_pt = 1.0 - pt
    g = float(gamma)
    if g == 2.0:
        mod = one_minus_pt * one_minus_pt
    elif g == 1.0:
        mod = one_minus_pt
    elif g == 0.0:
        mod = jnp.ones_like(one_minus_pt)
    else:
        mod = jnp.power(one_minus_pt, g)
    return (float(alpha) * float(class_weight)) * mod * bce


def _focal_mean_kernel(alpha, gamma, class_weight, logits, total, tile_rows,
                       acc_rows, steps_per_core, x_ref, y_ref, out_ref,
                       acc_ref):
    """Fused elementwise focal + fold into a small per-core VMEM accumulator."""
    c = pl.program_id(0)        # core (leading "parallel" axis)
    i = pl.program_id(1)        # reduction step within this core

    @pl.when(i == 0)
    def _():
        acc_ref[...] = jnp.zeros_like(acc_ref)

    focal = _focal_elementwise(x_ref[...], y_ref[...], alpha, gamma,
                               class_weight, logits)

    def _accumulate(f):
        # Fold the (tile_rows, 128) tile into the fixed (acc_rows, 128)
        # accumulator with static sublane-aligned slices (pure VPU adds).
        part = f[0:acc_rows, :]
        for k in range(1, tile_rows // acc_rows):
            part = part + f[k * acc_rows:(k + 1) * acc_rows, :]
        acc_ref[...] += part

    # Validity mask for the padded / partial-block tail. Row-index based so
    # nothing approaches int32 range, and only evaluated on steps whose
    # logical row range can touch invalid rows (typically just the last tile).
    l = c * steps_per_core + i               # logical tile index
    full_rows = total // LANES               # rows where all 128 lanes valid
    rem = total % LANES                      # valid lanes in the boundary row
    need_mask = (l + 1) * tile_rows > full_rows

    @pl.when(jnp.logical_not(need_mask))
    def _():
        _accumulate(focal)

    @pl.when(need_mask)
    def _():
        row_id = jax.lax.broadcasted_iota(jnp.int32, (tile_rows, LANES), 0)
        grow = l * tile_rows + row_id        # global row index of each element
        valid = grow < full_rows
        if rem:
            lane_id = jax.lax.broadcasted_iota(jnp.int32, (tile_rows, LANES), 1)
            valid = jnp.logical_or(
                valid, jnp.logical_and(grow == full_rows, lane_id < rem))
        _accumulate(jnp.where(valid, focal, 0.0))

    # Finalize: fold this core's accumulator into its tiny lane-dense (8, 128)
    # output block (constant HBM writeback regardless of tile size).
    @pl.when(i == steps_per_core - 1)
    def _():
        a = acc_ref[...]
        folded = a[0:8, :]
        for k in range(1, acc_rows // 8):
            folded = folded + a[k * 8:(k + 1) * 8, :]
        out_ref[...] = folded


def _focal_map_kernel(alpha, gamma, class_weight, logits, x_ref, y_ref, o_ref):
    """reduction=None path: write the per-element focal map (input dtype)."""
    o_ref[...] = _focal_elementwise(x_ref[...], y_ref[...], alpha, gamma,
                                    class_weight, logits).astype(o_ref.dtype)


def focal_loss(pr, gt, alpha=1.0, gamma=2.0, class_weights=None, logits=True,
               reduction="mean"):
    """Pallas implementation of FocalLoss.forward."""
    assert reduction in ("mean", None)
    # TODO(synk): tensor-valued (e.g. per-channel) class_weights broadcasting
    # is not implemented in-kernel; only scalar class_weights is supported.
    if class_weights is None:
        cw = 1.0
    else:
        cw_arr = np.asarray(class_weights)
        if cw_arr.size != 1:
            raise NotImplementedError(
                "focal_loss: only scalar class_weights is supported")
        cw = float(cw_arr.reshape(()))

    orig_shape = pr.shape
    x = pr.reshape(-1)
    y = gt.reshape(-1)
    P = int(x.shape[0])

    rows = -(-P // LANES)
    pad = rows * LANES - P
    if pad:
        # Only a (<128-element) tail pad; skipped entirely (no HBM input
        # copies) in the common case where P % 128 == 0.
        x = jnp.pad(x, (0, pad))
        y = jnp.pad(y, (0, pad))
    xp = x.reshape(rows, LANES)
    yp = y.reshape(rows, LANES)

    tile_rows = min(MAX_TILE_ROWS, -(-rows // 8) * 8)
    nblocks = -(-rows // tile_rows)   # partial final block handled by Pallas
    tile_spec = pl.BlockSpec((tile_rows, LANES), lambda i: (i, 0))

    if reduction == "mean":
        acc_rows = (ACC_ROWS_TARGET if tile_rows % ACC_ROWS_TARGET == 0
                    else tile_rows)
        steps = -(-nblocks // NUM_CORES)
        last_block = nblocks - 1

        def in_map(c, i):
            # Clamp so the duplicate steps (when nblocks % NUM_CORES != 0)
            # re-read the last block; their contribution is masked in-kernel.
            return (jnp.minimum(c * steps + i, last_block), 0)

        in_spec = pl.BlockSpec((tile_rows, LANES), in_map)
        partials = pl.pallas_call(
            functools.partial(_focal_mean_kernel, alpha, gamma, cw,
                              bool(logits), P, tile_rows, acc_rows, steps),
            out_shape=jax.ShapeDtypeStruct((NUM_CORES * 8, LANES),
                                           jnp.float32),
            grid=(NUM_CORES, steps),
            in_specs=[in_spec, in_spec],
            # One tiny lane-dense (8,128) partial block per core.
            out_specs=pl.BlockSpec((8, LANES), lambda c, i: (c, 0)),
            scratch_shapes=[pltpu.VMEM((acc_rows, LANES), jnp.float32)],
            compiler_params=pltpu.CompilerParams(
                dimension_semantics=("parallel", "arbitrary")),
        )(xp, yp)
        return jnp.sum(partials) / jnp.float32(P)

    # reduction=None: per-element focal map in the input dtype.
    fmap = pl.pallas_call(
        functools.partial(_focal_map_kernel, alpha, gamma, cw, bool(logits)),
        out_shape=jax.ShapeDtypeStruct((rows, LANES), pr.dtype),
        grid=(nblocks,),
        in_specs=[tile_spec, tile_spec],
        out_specs=tile_spec,
        compiler_params=pltpu.CompilerParams(
            dimension_semantics=("parallel",)),
    )(xp, yp)
    if pad:
        return fmap.reshape(-1)[:P].reshape(orig_shape)
    return fmap.reshape(orig_shape)


def focal_loss_ref(pr, gt, alpha=1.0, gamma=2.0, class_weights=None,
                   logits=True, reduction="mean"):
    """Pure-JAX reference mirroring the PyTorch module."""
    cw = 1.0 if class_weights is None else class_weights
    x = pr.astype(jnp.float32)
    y = gt.astype(jnp.float32)
    if logits:
        bce = jnp.maximum(x, 0.0) - x * y + jnp.log1p(jnp.exp(-jnp.abs(x)))
    else:
        bce = -(y * jnp.maximum(jnp.log(x), -100.0)
                + (1.0 - y) * jnp.maximum(jnp.log(1.0 - x), -100.0))
    pt = jnp.exp(-bce)
    focal = alpha * (1.0 - pt) ** gamma * bce * cw
    if reduction == "mean":
        return jnp.mean(focal)
    return focal


if __name__ == "__main__":
    key = jax.random.PRNGKey(0)
    k1, k2, k3, k4 = jax.random.split(key, 4)

    # Default module config: alpha=1, gamma=2, logits=True, reduction='mean'.
    N, C, H, W = 2, 4, 16, 16
    pr = jax.random.normal(k1, (N, C, H, W), jnp.float32) * 2.0
    gt = jax.random.bernoulli(k2, 0.5, (N, C, H, W)).astype(jnp.float32)

    loss = focal_loss(pr, gt, alpha=1.0, gamma=2.0, logits=True,
                      reduction="mean")
    loss = jax.block_until_ready(loss)
    ref = focal_loss_ref(pr, gt, alpha=1.0, gamma=2.0, logits=True,
                         reduction="mean")
    np.testing.assert_allclose(np.asarray(loss), np.asarray(ref),
                               rtol=1e-5, atol=1e-5)

    # reduction=None path (per-element focal map, dtype preserving).
    fmap = focal_loss(pr, gt, alpha=1.0, gamma=2.0, logits=True,
                      reduction=None)
    fmap = jax.block_until_ready(fmap)
    fmap_ref = focal_loss_ref(pr, gt, alpha=1.0, gamma=2.0, logits=True,
                              reduction=None)
    np.testing.assert_allclose(np.asarray(fmap), np.asarray(fmap_ref),
                               rtol=1e-5, atol=1e-5)

    # Odd element count (not a multiple of 128) to exercise the tail pad and
    # the boundary-lane validity mask.
    pr2 = jax.random.normal(k3, (3, 5, 7, 11), jnp.float32)
    gt2 = jax.random.bernoulli(k4, 0.5, (3, 5, 7, 11)).astype(jnp.float32)
    loss2 = focal_loss(pr2, gt2, alpha=0.5, gamma=2.0, class_weights=2.0,
                       logits=True, reduction="mean")
    loss2 = jax.block_until_ready(loss2)
    ref2 = focal_loss_ref(pr2, gt2, alpha=0.5, gamma=2.0, class_weights=2.0,
                          logits=True, reduction="mean")
    np.testing.assert_allclose(np.asarray(loss2), np.asarray(ref2),
                               rtol=1e-5, atol=1e-5)

    print("KERNEL_OK")
</pallas_src>

<mosaic_0001>
module attributes {stable_mosaic.version = 11 : i64} {
  func.func @_focal_mean_kernel(%arg0: i32, %arg1: i32, %arg2: memref<16x128xf32, #tpu.memory_space<vmem>>, %arg3: memref<16x128xf32, #tpu.memory_space<vmem>>, %arg4: memref<8x128xf32, #tpu.memory_space<vmem>>, %arg5: memref<16x128xf32, #tpu.memory_space<vmem>>) attributes {dimension_semantics = [#tpu.dimension_semantics<parallel>, #tpu.dimension_semantics<arbitrary>], iteration_bounds = array<i64: 2, 1>, scalar_prefetch = 0 : i64, scratch_operands = 1 : i64, tpu.core_type = #tpu.core_type<tc>, window_params = [{transform_indices = @transform_0, window_bounds = array<i64: 16, 128>}, {transform_indices = @transform_1, window_bounds = array<i64: 16, 128>}, {transform_indices = @transform_2, window_bounds = array<i64: 8, 128>}]} {
    %c0_i32 = arith.constant 0 : i32
    %0 = arith.cmpi eq, %arg1, %c0_i32 : i32
    %1 = arith.extui %0 : i1 to i32
    %c0_i32_0 = arith.constant 0 : i32
    %2 = arith.cmpi ne, %1, %c0_i32_0 : i32
    scf.if %2 {
      %cst_14 = arith.constant 0.000000e+00 : f32
      %37 = vector.broadcast %cst_14 : f32 to vector<16x128xf32>
      %c0_15 = arith.constant 0 : index
      %c0_16 = arith.constant 0 : index
      %38 = vector.load %arg5[%c0_15, %c0_16] : memref<16x128xf32, #tpu.memory_space<vmem>>, vector<16x128xf32>
      tpu.vector_store %arg5[%c0_15, %c0_16], %37 {strides = array<i32>} : memref<16x128xf32, #tpu.memory_space<vmem>>, vector<16x128xf32>,
    } else {
    }
    %c0 = arith.constant 0 : index
    %c0_1 = arith.constant 0 : index
    %3 = vector.load %arg2[%c0, %c0_1] : memref<16x128xf32, #tpu.memory_space<vmem>>, vector<16x128xf32>
    %c0_2 = arith.constant 0 : index
    %c0_3 = arith.constant 0 : index
    %4 = vector.load %arg3[%c0_2, %c0_3] : memref<16x128xf32, #tpu.memory_space<vmem>>, vector<16x128xf32>
    %cst = arith.constant 0.000000e+00 : f32
    %5 = vector.broadcast %cst : f32 to vector<16x128xf32>
    %6 = arith.maximumf %3, %5 : vector<16x128xf32>
    %7 = arith.mulf %3, %4 : vector<16x128xf32>
    %8 = arith.subf %6, %7 : vector<16x128xf32>
    %9 = math.absf %3 : vector<16x128xf32>
    %cst_4 = arith.constant 0.000000e+00 : f32
    %10 = vector.broadcast %cst_4 : f32 to vector<16x128xf32>
    %11 = arith.subf %10, %9 : vector<16x128xf32>
    %12 = math.exp %11 : vector<16x128xf32>
    %13 = math.log1p %12 : vector<16x128xf32>
    %14 = arith.addf %8, %13 : vector<16x128xf32>
    %cst_5 = arith.constant 0.000000e+00 : f32
    %15 = vector.broadcast %cst_5 : f32 to vector<16x128xf32>
    %16 = arith.subf %15, %14 : vector<16x128xf32>
    %17 = math.exp %16 : vector<16x128xf32>
    %cst_6 = arith.constant 1.000000e+00 : f32
    %18 = vector.broadcast %cst_6 : f32 to vector<16x128xf32>
    %19 = arith.subf %18, %17 : vector<16x128xf32>
    %20 = arith.mulf %19, %19 : vector<16x128xf32>
    %cst_7 = arith.constant 1.000000e+00 : f32
    %21 = vector.broadcast %cst_7 : f32 to vector<16x128xf32>
    %22 = arith.mulf %21, %20 : vector<16x128xf32>
    %23 = arith.mulf %22, %14 : vector<16x128xf32>
    %c1_i32 = arith.constant 1 : i32
    %24 = arith.muli %arg0, %c1_i32 : i32
    %25 = arith.addi %24, %arg1 : i32
    %c1_i32_8 = arith.constant 1 : i32
    %26 = arith.addi %25, %c1_i32_8 : i32
    %c16_i32 = arith.constant 16 : i32
    %27 = arith.muli %26, %c16_i32 : i32
    %c16_i32_9 = arith.constant 16 : i32
    %28 = arith.cmpi sgt, %27, %c16_i32_9 : i32
    %true = arith.constant true
    %29 = arith.xori %28, %true : i1
    %30 = arith.extui %29 : i1 to i32
    %c0_i32_10 = arith.constant 0 : i32
    %31 = arith.cmpi ne, %30, %c0_i32_10 : i32
    scf.if %31 {
      %c0_14 = arith.constant 0 : index
      %c0_15 = arith.constant 0 : index
      %37 = vector.load %arg5[%c0_14, %c0_15] : memref<16x128xf32, #tpu.memory_space<vmem>>, vector<16x128xf32>
      %38 = arith.addf %37, %23 : vector<16x128xf32>
      %c0_16 = arith.constant 0 : index
      %c0_17 = arith.constant 0 : index
      %39 = vector.load %arg5[%c0_16, %c0_17] : memref<16x128xf32, #tpu.memory_space<vmem>>, vector<16x128xf32>
      tpu.vector_store %arg5[%c0_16, %c0_17], %38 {strides = array<i32>} : memref<16x128xf32, #tpu.memory_space<vmem>>, vector<16x128xf32>,
    } else {
    }
    %32 = arith.extui %28 : i1 to i32
    %c0_i32_11 = arith.constant 0 : i32
    %33 = arith.cmpi ne, %32, %c0_i32_11 : i32
    scf.if %33 {
      %37 = tpu.iota {dimensions = array<i32: 0>} : vector<16x128xi32>
      %c16_i32_14 = arith.constant 16 : i32
      %38 = arith.muli %25, %c16_i32_14 : i32
      %39 = vector.broadcast %38 : i32 to vector<16x128xi32>
      %40 = arith.addi %39, %37 : vector<16x128xi32>
      %c16_i32_15 = arith.constant 16 : i32
      %41 = vector.broadcast %c16_i32_15 : i32 to vector<16x128xi32>
      %42 = arith.cmpi slt, %40, %41 : vector<16x128xi32>
      %cst_16 = arith.constant 0.000000e+00 : f32
      %43 = vector.broadcast %cst_16 : f32 to vector<16x128xf32>
      %44 = arith.select %42, %23, %43 : vector<16x128xi1>, vector<16x128xf32>
      %c0_17 = arith.constant 0 : index
      %c0_18 = arith.constant 0 : index
      %45 = vector.load %arg5[%c0_17, %c0_18] : memref<16x128xf32, #tpu.memory_space<vmem>>, vector<16x128xf32>
      %46 = arith.addf %45, %44 : vector<16x128xf32>
      %c0_19 = arith.constant 0 : index
      %c0_20 = arith.constant 0 : index
      %47 = vector.load %arg5[%c0_19, %c0_20] : memref<16x128xf32, #tpu.memory_space<vmem>>, vector<16x128xf32>
      tpu.vector_store %arg5[%c0_19, %c0_20], %46 {strides = array<i32>} : memref<16x128xf32, #tpu.memory_space<vmem>>, vector<16x128xf32>,
    } else {
    }
    %c0_i32_12 = arith.constant 0 : i32
    %34 = arith.cmpi eq, %arg1, %c0_i32_12 : i32
    %35 = arith.extui %34 : i1 to i32
    %c0_i32_13 = arith.constant 0 : i32
    %36 = arith.cmpi ne, %35, %c0_i32_13 : i32
    scf.if %36 {
      %c0_14 = arith.constant 0 : index
      %c0_15 = arith.constant 0 : index
      %37 = vector.load %arg5[%c0_14, %c0_15] : memref<16x128xf32, #tpu.memory_space<vmem>>, vector<16x128xf32>
      %38 = vector.extract_strided_slice %37 {offsets = [0, 0], sizes = [8, 128], strides = [1, 1]} : vector<16x128xf32> to vector<8x128xf32>
      %39 = vector.extract_strided_slice %37 {offsets = [8, 0], sizes = [8, 128], strides = [1, 1]} : vector<16x128xf32> to vector<8x128xf32>
      %40 = arith.addf %38, %39 : vector<8x128xf32>
      %c0_16 = arith.constant 0 : index
      %c0_17 = arith.constant 0 : index
      %41 = vector.load %arg4[%c0_16, %c0_17] : memref<8x128xf32, #tpu.memory_space<vmem>>, vector<8x128xf32>
      tpu.vector_store %arg4[%c0_16, %c0_17], %40 {strides = array<i32>} : memref<8x128xf32, #tpu.memory_space<vmem>>, vector<8x128xf32>,
    } else {
    }
    return
  }
  func.func @transform_0(%arg0: i32, %arg1: i32) -> (i32, i32) {
    %c1_i32 = arith.constant 1 : i32
    %0 = arith.muli %arg0, %c1_i32 : i32
    %1 = arith.addi %0, %arg1 : i32
    %c0_i32 = arith.constant 0 : i32
    %2 = arith.minsi %1, %c0_i32 : i32
    %c0_i32_0 = arith.constant 0 : i32
    %c0_i32_1 = arith.constant 0 : i32
    return %2, %c0_i32_0 : i32, i32
  }
  func.func @transform_1(%arg0: i32, %arg1: i32) -> (i32, i32) {
    %c1_i32 = arith.constant 1 : i32
    %0 = arith.muli %arg0, %c1_i32 : i32
    %1 = arith.addi %0, %arg1 : i32
    %c0_i32 = arith.constant 0 : i32
    %2 = arith.minsi %1, %c0_i32 : i32
    %c0_i32_0 = arith.constant 0 : i32
    %c0_i32_1 = arith.constant 0 : i32
    return %2, %c0_i32_0 : i32, i32
  }
  func.func @transform_2(%arg0: i32, %arg1: i32) -> (i32, i32) {
    %c0_i32 = arith.constant 0 : i32
    %c0_i32_0 = arith.constant 0 : i32
    return %arg0, %c0_i32 : i32, i32
  }
}

</mosaic_0001>

<bundles_post_ra>
// kernel: tpu_custom_call.1
= control target key start
LH: loop header
LB: loop body
LE: loop exit
PB: predicated region body
PF: predicated region fallthrough
CT: control target
= control target key end

     0   :  { %7 = vsyncpa [#allocation4], 0  ;;  %s997_s0 = inlined_call_operand.hbm [shape: f32[16,128], index: 0, kind: input, shape index: {}]   ;;  %s998_s1 = inlined_call_operand.hbm [shape: f32[16,128], index: 1, kind: input, shape index: {}]   ;;  %s999_s2 = inlined_call_operand.hbm [shape: f32[16,128], index: 2, kind: output, shape index: {}]  }
   0x1   :  { %9 = vsyncpa [#allocation4 + $0x1], 0 }
   0x2   :  { %10 = vsyncpa [#allocation7], 0 }
   0x3   :  { %12 = vsyncpa [#allocation7 + $0x1], 0 }
   0x4   :  { %13 = vsyncpa [#allocation5], 0 }
   0x5   :  { %15 = vsyncpa [#allocation5 + $0x1], 0  ;;  %s774_s9 = smov 0   ;;  %s776_s10 = smov 0  }
   0x6   :  { %s778_s11 = smov 0   ;;  %s780_s12 = smov 0  }
   0x7   :  { %s782_s13 = smov 0   ;;  %s784_s14 = smov 0  }
   0x8   :  { %s786_s15 = smov 0   ;;  %s788_s16 = smov 0  }
   0x9 LB: > { %s452_s17 = sadd.s32 4294967295, %s751_s16   ;;  %s453_s18 = sadd.s32 4294967294, %s751_s16   ;;  %s751_s16 = sphi %s788_s16, %s21_s16   ;;  %s747_s15 = sphi %s786_s15, %s1018_s15   ;;  %s743_s14 = sphi %s784_s14, %s1017_s14   ;;  %s739_s13 = sphi %s782_s13, %s987_s13   ;;  %s735_s12 = sphi %s780_s12, %s1016_s12   ;;  %s731_s11 = sphi %s778_s11, %s1015_s11   ;;  %s727_s10 = sphi %s776_s10, %s1014_s10   ;;  %s723_s9 = sphi %s774_s9, %s1013_s9  }
   0xa   : > { %s33_s19 = sadd.s32 1, %s747_s15  ;;  %p720_p1 = scmp.ne.s32.totalorder %s739_s13, 0 }
   0xb   : > { %p35_p0 = scmp.ge.s32.totalorder %s33_s19, 2  ;;  %p54_p2 = scmp.eq.s32.totalorder %s751_s16, 0 }
   0xc   : > { %p59_p3 = scmp.ne.s32.totalorder %s739_s13, %s735_s12  ;;  %p60_p5 = scmp.eq.s32.totalorder %s452_s17, 0 }
   0xd   : > { %s1020_s19 = smov (%p35_p0, %s33_s19), 0  ;;  %p820_p4 = por %p720_p1, %p54_p2 }
   0xe   : > { %p824_p6 = por %p60_p5, %p59_p3  ;;  %s101_s22 = ssub.s32 %s747_s15, %s1020_s19 }
   0xf   : > { %p102_p7 = scmp.eq.s32.totalorder %s101_s22, 0  ;;  %s104_s23 = sadd.s32 1, %s731_s11 }
  0x10   : > { %s1003_s21 = scalar_select %p824_p6, 1, 0 }
  0x11   : > { %s832_s24 = scalar_select %p102_p7, %s731_s11, %s104_s23  }
  0x12   : > { %p114_p8 = scmp.ne.s32.totalorder %s731_s11, %s727_s10  ;;  %p115_p9 = scmp.eq.s32.totalorder %s452_s17, 1 }
  0x13   : > { %p120_p10 = scmp.ne.s32.totalorder %s727_s10, %s723_s9  ;;  %p121_p11 = scmp.eq.s32.totalorder %s453_s18, 1 }
  0x14   : > { %p838_p12 = por %p115_p9, %p114_p8  ;;  %p495_p1 = scmp.lt.s32.totalorder %s751_s16, 2 }
  0x15   : > { %p843_p0 = por %p121_p11, %p120_p10  ;;  %s753_s27 = smov [#allocation3]  }
  0x16   : > { %s1004_s25 = scalar_select %p838_p12, 1, 0 }
  0x17   : > { %s1005_s26 = scalar_select %p843_p0, 1, 0 }
  0x18   : > { %s155_s28 = sshll.u32 %s753_s27, 4  ;;  %p850_p2 = pnand %p495_p1, %p820_p4  ;;  %s156_s28 = int_to_ptr.vmem [resolvable:$true] %s155_s28 }
  0x19   : > { %s584_s4 = scalar_lea.hbm %s997_s0, 256 }
  0x1a   : > { %p585_p3 = scmp.ne.s32.totalorder %s997_s0, %s584_s4  ;;  %p586_p5 = pneg %p850_p2 }
  0x1b   : > { %p591_p8 = scmp.lt.u32.totalorder %s584_s4, %s584_s4  ;;  %p593_p9 = scmp.lt.u32.totalorder %s584_s4, %s997_s0 }
  0x1c   : > { %p587_p7 = pnand %p586_p5, %p585_p3 }
  0x1d   : > { %p594_p10 = por %p593_p9, %p591_p8 }
  0x1e   : > { %p588_p4 = pneg %p587_p7 }
  0x20   : > { %p595_p11 = pnand %p594_p10, %p588_p4 }
  0x22   : > { %598 = shalt.err (!%p595_p11)
}
  0x23   : > { %s599_s12 = scalar_lea.vmem %s156_s28, 256  ;;  %s606_s17 = scalar_lea.vmem %s156_s28, 512 }
  0x24   : > { %p600_p1 = scmp.ne.s32.totalorder %s156_s28, %s599_s12  ;;  %p607_p12 = scmp.lt.s32.totalorder %s156_s28, %s156_s28 }
  0x25   : > { %p608_p6 = scmp.lt.s32.totalorder %s606_s17, %s599_s12 }
  0x26   : > { %p602_p13 = pnand %p600_p1, %p586_p5 }
  0x27   : > { %p609_p3 = por %p608_p6, %p607_p12 }
  0x28   : > { %p603_p0 = pneg %p602_p13 }
  0x2a   : > { %p610_p7 = pnand %p609_p3, %p603_p0 }
  0x2c   : > { %613 = shalt.err (!%p610_p7)
}
  0x2d   : > { %s754_s18 = smov 128   ;;  %s755_s20 = smov 8  }
  0x2e   : > { %487 = dma.hbm_to_vmem [thread:$0]  (!%p850_p2), %s997_s0, 256, %s156_s28, [#allocation4], %s754_s18, %s754_s18, %s755_s20  }
  0x2f   : > { %p462_p13 = scmp.ge.s32.totalorder %s751_s16, 1  ;;  %p187_p4 = scmp.lt.s32.totalorder %s751_s16, 3 }
  0x30   : > { %s756_s30 = smov [#allocation6]   ;;  %s614_s6 = scalar_lea.hbm %s998_s1, 256 }
  0x31   : > { %p881_p8 = pnand %p462_p13, %p187_p4  ;;  %s179_s3 = sshll.u32 %s756_s30, 4  ;;  %s180_s3 = int_to_ptr.vmem [resolvable:$true] %s179_s3 }
  0x32   : > { %p615_p6 = scmp.ne.s32.totalorder %s998_s1, %s614_s6  ;;  %p621_p9 = scmp.lt.u32.totalorder %s614_s6, %s614_s6 }
  0x33   : > { %s1007_s27 = scalar_select %p881_p8, 1, 0 }
  0x34   : > { %p617_p12 = pnand %p615_p6, %p586_p5  ;;  %p623_p10 = scmp.lt.u32.totalorder %s614_s6, %s998_s1 }
  0x36   : > { %p618_p0 = pneg %p617_p12  ;;  %p624_p11 = por %p623_p10, %p621_p9 }
  0x38   : > { %p625_p1 = pnand %p624_p11, %p618_p0 }
  0x3a   : > { %628 = shalt.err (!%p625_p1)
}
  0x3b   : > { %s629_s17 = scalar_lea.vmem %s180_s3, 256  ;;  %s636_s22 = scalar_lea.vmem %s180_s3, 512 }
  0x3c   : > { %p630_p3 = scmp.ne.s32.totalorder %s180_s3, %s629_s17  ;;  %p637_p4 = scmp.lt.s32.totalorder %s180_s3, %s180_s3 }
  0x3d   : > { %p638_p8 = scmp.lt.s32.totalorder %s636_s22, %s629_s17 }
  0x3e   : > { %p632_p7 = pnand %p630_p3, %p586_p5 }
  0x3f   : > { %p639_p6 = por %p638_p8, %p637_p4 }
  0x40   : > { %p633_p13 = pneg %p632_p7 }
  0x42   : > { %p640_p12 = pnand %p639_p6, %p633_p13 }
  0x44   : > { %643 = shalt.err (!%p640_p12)
}
  0x45   : > { %490 = dma.hbm_to_vmem [thread:$0]  (!%p850_p2), %s998_s1, 256, %s180_s3, [#allocation7], %s754_s18, %s754_s18, %s755_s20  }
  0x46   : > { %p1008_p0 = scmp.ne.s32.totalorder %s1007_s27, 0 }
  0x47   : > { %s193_s4 = sand.u32 (!%p1008_p0), 1, %s739_s13   ;;  %p1009_p5 = scmp.ne.s32.totalorder (!%p1008_p0), %s1003_s21, 0 }
  0x48   : > { %191 = sbr.rel (%p1008_p0) target bundleno = 182 (0xb6), region = 28  ;;  %s463_s5 = sshll.u32 (!%p1008_p0), %s193_s4, 4 }
  0x49   : > { %s194_s6 = scalar_lea.sflag (!%p1008_p0), [#allocation4], %s193_s4  ;;  %s197_s7 = scalar_lea.vmem (!%p1008_p0), [#allocation3], %s463_s5 }
  0x4f   : > { %709 = dma.done.wait (%p1009_p5), %s194_s6, 256  }
  0x50   : > { %711 = vsyncadd (%p1009_p5), %s194_s6, 4294967040  ;;  %s203_s29 = scalar_lea.sflag [#allocation7], %s193_s4  ;;  %s206_s8 = scalar_lea.vmem [#allocation6], %s463_s5 }
  0x51   : > { %713 = dma.done.wait (%p1009_p5), %s203_s29, 256  }
  0x52   : > { %715 = vsyncadd (%p1009_p5), %s203_s29, 4294967040  ;;  %s229_s18 = sand.u32 1, %s727_s10   ;;  %s476_s20 = sshll.u32 %s743_s14, 4  ;;  %v757_v0 = vmov 0.0   ;;  %v246_v1 = vld [vmem:[%s197_s7] sm:$0xff]  ;;  %v247_v2 = vld [vmem:[%s197_s7 + $0x8] sm:$0xff] }
  0x53   : > { %s923_s27 = sshll.u32 %s229_s18, 3  ;;  %244 = vst [vmem:[#allocation2] sm:$0xff] %v757_v0  ;;  %245 = vst [vmem:[#allocation2 + $0x8] sm:$0xff] %v757_v0  ;;  %s927_s3 = sadd.s32 16, %s476_s20  ;;  %v256_v3 = vand.u32 2147483647, %v246_v1 }
  0x54   : > { %v257_v4 = vand.u32 2147483647, %v247_v2  ;;  %v248_v15 = vld [vmem:[%s206_s8] sm:$0xff]  ;;  %v249_v16 = vld [vmem:[%s206_s8 + $0x8] sm:$0xff]  ;;  %v250_v18 = vmax.f32 %v246_v1, 0.0  ;;  %v251_v22 = vmax.f32 %v247_v2, 0.0 }
  0x55   : > { %v258_v5 = vsub.f32 0.0, %v256_v3  ;;  %v252_v19 = vmul.f32 %v248_v15, %v246_v1  ;;  %v253_v23 = vmul.f32 %v249_v16, %v247_v2  ;;  %s231_s21 = scalar_lea.vmem [#allocation8], %s923_s27  ;;  %p467_p2 = scmp.gt.s32.totalorder %s927_s3, 16 }
  0x56   : > { %v259_v6 = vsub.f32 0.0, %v257_v4 }
  0x57   : > { %v260_v7 = vmul.f32 1.442695, %v258_v5  ;;  %v254_v27 = vsub.f32 %v250_v18, %v252_v19  ;;  %v255_v30 = vsub.f32 %v251_v22, %v253_v23 }
  0x58   : > { %v262_v8 = vmul.f32 1.442695, %v259_v6 }
  0x59   : > { %572 = vpow2.f32 %v260_v7 }
  0x5a   : > { %574 = vpow2.f32 %v262_v8  ;;  %v304_v49 = vld [vmem:[#allocation2] sm:$0xff] (!%p467_p2)  ;;  %v305_v50 = vld [vmem:[#allocation2 + $0x8] sm:$0xff] (!%p467_p2) }
  0x63   : > { %v573_v9 = vpop.eup %572 }
  0x64   : > { %v575_v10 = vpop.eup %574  ;;  %v264_v11 = vadd.f32 1.0, %v573_v9  ;;  %v267_v13 = vmul.f32 -0.5, %v573_v9  ;;  %v270_v20 = vand.u32 2147483647, %v573_v9 }
  0x65   : > { %v273_v12 = vadd.f32 1.0, %v575_v10  ;;  %v276_v14 = vmul.f32 -0.5, %v575_v10  ;;  %v279_v24 = vand.u32 2147483647, %v575_v10 }
  0x66   : > { %576 = vlog2.f32 %v264_v11  ;;  %v268_v17 = vadd.f32 1.0, %v267_v13  ;;  %vm271_vm0 = vcmp.lt.f32.partialorder %v270_v20, 0.0004427343 }
  0x67   : > { %578 = vlog2.f32 %v273_v12  ;;  %v277_v21 = vadd.f32 1.0, %v276_v14  ;;  %vm280_vm1 = vcmp.lt.f32.partialorder %v279_v24, 0.0004427343 }
  0x68   : > { %v269_v25 = vmul.f32 %v573_v9, %v268_v17 }
  0x69   : > { %v278_v28 = vmul.f32 %v575_v10, %v277_v21 }
  0x70   : > { %v577_v26 = vpop.eup %576 }
  0x71   : > { %v579_v29 = vpop.eup %578  ;;  %v266_v31 = vmul.f32 0.6931472, %v577_v26 }
  0x72   : > { %v275_v32 = vmul.f32 0.6931472, %v579_v29 }
  0x73   : > { %v272_v33 = vsel %vm271_vm0, %v269_v25, %v266_v31 }
  0x74   : > { %v281_v34 = vsel %vm280_vm1, %v278_v28, %v275_v32  ;;  %v282_v35 = vadd.f32 %v272_v33, %v254_v27 }
  0x75   : > { %v283_v36 = vadd.f32 %v281_v34, %v255_v30 }
  0x76   : > { %v284_v37 = vsub.f32 0.0, %v282_v35 }
  0x77   : > { %v285_v38 = vsub.f32 0.0, %v283_v36 }
  0x78   : > { %v286_v39 = vmul.f32 1.442695, %v284_v37 }
  0x79   : > { %v288_v40 = vmul.f32 1.442695, %v285_v38 }
  0x7a   : > { %580 = vpow2.f32 %v286_v39 }
  0x7b   : > { %582 = vpow2.f32 %v288_v40 }
  0x84   : > { %v581_v41 = vpop.eup %580  ;;  %303 = sbr.rel (%p467_p2) target bundleno = 143 (0x8f), region = 44 }
  0x85   : > { %v583_v42 = vpop.eup %582  ;;  %v290_v43 = vsub.f32 1.0, %v581_v41 }
  0x86   : > { %v291_v44 = vsub.f32 1.0, %v583_v42 }
  0x87   : > { %v292_v45 = vmul.f32 %v290_v43, %v290_v43 }
  0x88   : > { %v293_v46 = vmul.f32 %v291_v44, %v291_v44 }
  0x89   : > { %v294_v47 = vmul.f32 %v292_v45, %v282_v35 }
  0x8a   : > { %v295_v48 = vmul.f32 %v293_v46, %v283_v36 }
  0x8b   : > { %v306_v51 = vadd.f32 %v304_v49, %v294_v47 }
  0x8c   : > { %v307_v52 = vadd.f32 %v305_v50, %v295_v48 }
  0x8d   : > { %308 = vst [vmem:[#allocation2] sm:$0xff] %v306_v51 }
  0x8e   : > { %309 = vst [vmem:[#allocation2 + $0x8] sm:$0xff] %v307_v52 }
  0x8f PF: > { %p468_p8 = scmp.le.s32.totalorder %s927_s3, 16 }
  0x90   : > { %v313_v53 = vlaneseq (!%p468_p8)  ;;  %v317_v54 = vstv (!%p468_p8), %s476_s20 }
  0x91   : > { %312 = sbr.rel (%p468_p8) target bundleno = 157 (0x9d), region = 48 }
  0x92   : > { %v314_v55 = vshrl.u32 (!%p468_p8), %v313_v53, 7 }
  0x94   : > { %v318_v56 = vadd.s32 (!%p468_p8), %v317_v54, %v314_v55  ;;  %v315_v57 = vadd.s32 (!%p468_p8), 8, %v314_v55  ;;  %v324_v58 = vld [vmem:[#allocation2] sm:$0xff] (!%p468_p8) }
  0x95   : > { %v325_v61 = vld [vmem:[#allocation2 + $0x8] sm:$0xff] (!%p468_p8) }
  0x96   : > { %vm320_vm2 = vcmp.lt.s32.totalorder (!%p468_p8), %v318_v56, 16  ;;  %v319_v59 = vadd.s32 (!%p468_p8), %v317_v54, %v315_v57 }
  0x97   : > { %v322_v60 = vsel (!%p468_p8), %vm320_vm2, %v294_v47, 0.0 }
  0x98   : > { %v326_v62 = vadd.f32 %v324_v58, %v322_v60  ;;  %vm321_vm3 = vcmp.lt.s32.totalorder %v319_v59, 16 }
  0x99   : > { %v323_v63 = vsel %vm321_vm3, %v295_v48, 0.0 }
  0x9a   : > { %328 = vst [vmem:[#allocation2] sm:$0xff] %v326_v62  ;;  %v327_v0 = vadd.f32 %v325_v61, %v323_v63 }
  0x9c   : > { %329 = vst [vmem:[#allocation2 + $0x8] sm:$0xff] %v327_v0 }
  0x9d PF: > { %s471_s28 = sshll.u32 %s743_s14, 7  ;;  %s351_s23 = sshll.u32 %s231_s21, 4  ;;  %s942_s23 = int_to_ptr.vmem [resolvable:$true] %s351_s23 }
  0x9e   : > { %s938_s22 = scalar_lea.hbm %s999_s2, %s471_s28  ;;  %s338_s30 = scalar_lea.sflag [#allocation5], %s229_s18 }
  0x9f   : > { %s644_s4 = scalar_lea.vmem %s942_s23, 128  ;;  %p1010_p10 = scmp.ne.s32.totalorder %s1004_s25, 0 }
  0xa0   : > { %p645_p9 = scmp.ne.s32.totalorder %s942_s23, %s644_s4  ;;  %s758_s14 = smov [#allocation8]  }
  0xa1   : > { %v333_v1 = vld [vmem:[#allocation2] sm:$0xff]  ;;  %s648_s5 = sshll.u32 %s758_s14, 4  ;;  %s649_s5 = int_to_ptr.vmem [resolvable:$false] %s648_s5 }
  0xa2   : > { %p646_p11 = pnand %p645_p9, %p1010_p10  ;;  %s650_s6 = scalar_lea.vmem %s649_s5, 256 }
  0xa3   : > { %v334_v2 = vld [vmem:[#allocation2 + $0x8] sm:$0xff]  ;;  %p651_p3 = scmp.lt.s32.totalorder %s942_s23, %s649_s5  ;;  %p652_p7 = scmp.lt.s32.totalorder %s650_s6, %s644_s4 }
  0xa4   : > { %v335_v3 = vadd.f32 %v334_v2, %v333_v1  ;;  %p647_p1 = pneg %p646_p11 }
  0xa5   : > { %p653_p13 = por %p652_p7, %p651_p3 }
  0xa6   : > { %336 = vst [vmem:[%s231_s21] sm:$0xff] %v335_v3 }
  0xa7   : > { %p654_p4 = pnand %p653_p13, %p647_p1 }
  0xa9   : > { %657 = shalt.err (!%p654_p4)
}
  0xaa   : > { %s658_s7 = scalar_lea.hbm %s938_s22, 128  ;;  %s662_s18 = scalar_lea.hbm %s999_s2, 256 }
  0xab   : > { %p659_p6 = scmp.ne.s32.totalorder %s938_s22, %s658_s7  ;;  %p663_p5 = scmp.lt.u32.totalorder %s938_s22, %s999_s2 }
  0xac   : > { %p664_p2 = scmp.lt.u32.totalorder %s662_s18, %s658_s7  ;;  %p666_p9 = scmp.lt.u32.totalorder %s658_s7, %s938_s22 }
  0xad   : > { %p660_p12 = pnand %p659_p6, %p1010_p10 }
  0xae   : > { %p665_p8 = por %p664_p2, %p663_p5 }
  0xaf   : > { %p661_p0 = pneg %p660_p12 }
  0xb0   : > { %p667_p11 = por %p666_p9, %p665_p8 }
  0xb2   : > { %p668_p1 = pnand %p667_p11, %p661_p0 }
  0xb4   : > { %671 = shalt.err (!%p668_p1)
}
  0xb5   : > { %482 = dma.vmem_to_hbm [thread:$0]  (%p1010_p10), %s942_s23, 128, %s938_s22, %s338_s30  }
  0xb6 PF: > { %s363_s3 = sand.u32 1, %s723_s9   ;;  %p1011_p3 = scmp.ne.s32.totalorder %s1005_s26, 0 }
  0xb7   : > { %p1012_p7 = scmp.ge.s32.totalorder %s751_s16, 2  ;;  %s364_s21 = scalar_lea.sflag [#allocation5], %s363_s3 }
  0xb9   : > { %p492_p13 = pnand %p1012_p7, %p1011_p3 }
  0xbb   : > { %717 = dma.done.wait (!%p492_p13), %s364_s21, 128  }
  0xbc   : > { %719 = vsyncadd (!%p492_p13), %s364_s21, 4294967168  ;;  %s21_s16 = sadd.s32 1, %s751_s16   ;;  %s1013_s9 = smov %s727_s10 }
  0xbd   : > { %p18_p4 = scmp.ge.s32.totalorder %s21_s16, 4   ;;  %s1014_s10 = smov %s731_s11 }
  0xbe   : > { %s1015_s11 = smov %s832_s24  ;;  %s1016_s12 = smov %s739_s13 }
  0xbf   : > { %s987_s13 = smov 0   ;;  %s1017_s14 = smov %s747_s15 }
  0xc0   : > { %s1018_s15 = smov %s1020_s19  ;;  %20 = sbr.rel (!%p18_p4) target bundleno = 9 (0x9), region = 102 }
  0xc7   :  { %369 = vsyncpa [#allocation4], 1 }
  0xc8   :  { %371 = vsyncpa [#allocation4 + $0x1], 1 }
  0xc9   :  { %372 = vsyncpa [#allocation7], 1 }
  0xca   :  { %374 = vsyncpa [#allocation7 + $0x1], 1 }
  0xcb   :  { %375 = vsyncpa [#allocation5], 1 }
  0xcc   :  { %377 = vsyncpa [#allocation5 + $0x1], 1 }

</bundles_post_ra>
